<compile_context>
chip_gen: v7x
topology: tpu7x:2x2x1
jax: 0.10.0
libtpu: 0.0.40
codegen_flags: <defaults>
</compile_context>

<pallas_src>
import functools

import jax
import jax.numpy as jnp
from jax import lax
from jax.experimental import pallas as pl
from jax.experimental.pallas import tpu as pltpu


def _default_vmem_budget_bytes():
    """Generation-aware VMEM budget for the double-buffered pipeline blocks."""
    try:
        cap = int(pltpu.get_tpu_info().vmem_capacity_bytes)
    except Exception:
        cap = 64 << 20  # conservative fallback (v7x per-core VMEM)
    # ~1/4 of physical VMEM, clamped to [8 MiB, 24 MiB]: 24 MiB on v5e/v6e
    # (128 MiB physical), 16 MiB on v7x (64 MiB physical) — plenty of headroom
    # for compiler-internal scratch.
    return int(min(24 << 20, max(8 << 20, cap // 4)))


def _nll_loss_kernel(score_ref, label_ref, out_ref, *, hw, tile_p, mask_needed):
    """One (nb, C, tile_p) pixel tile.

    Computes per-pixel -log_softmax(score)[argmax(label)] and accumulates the
    (nb, 1, tile_p) per-lane partial sums into the output block, which stays
    resident in VMEM across the pixel-tile (reduction) grid axis.
    """
    s = pl.program_id(1)  # parallel pixel-split index (megacore on v7x)
    i = pl.program_id(2)  # pixel-tile index within the split (reduction axis)

    @pl.when(i == 0)
    def _():
        out_ref[...] = jnp.zeros_like(out_ref)

    x = score_ref[...].astype(jnp.float32)      # (NB, C, TP)
    lbl = label_ref[...].astype(jnp.float32)    # (NB, C, TP)

    # log-softmax denominator per pixel (numerically stable), sublane reduce.
    m = jnp.max(x, axis=1, keepdims=True)                                # (NB,1,TP)
    lse = m + jnp.log(jnp.sum(jnp.exp(x - m), axis=1, keepdims=True))    # (NB,1,TP)

    # Fused argmax-over-label + gather-from-score in a single reduce.
    # Tie-break is "any maximal label channel" (identical to argmax for one-hot
    # or untied labels; exact float ties are a measure-zero deviation).
    lbl_max = jnp.max(lbl, axis=1, keepdims=True)                        # (NB,1,TP)
    picked = jnp.max(jnp.where(lbl == lbl_max, x, -jnp.inf),
                     axis=1, keepdims=True)                              # (NB,1,TP)

    per_pixel = lse - picked          # -log_softmax at the label channel

    if not mask_needed:
        # HW is a multiple of tile_p: every lane is a real pixel, no mask work.
        out_ref[...] += per_pixel
    else:
        # Only the very last global pixel tile is ragged; mask just there so
        # interior steps carry zero masking filler on the VPU.
        g = s * pl.num_programs(2) + i                  # global pixel-tile index
        last = pl.num_programs(1) * pl.num_programs(2) - 1

        @pl.when(g != last)
        def _():
            out_ref[...] += per_pixel

        @pl.when(g == last)
        def _():
            pix = lax.broadcasted_iota(jnp.int32, per_pixel.shape, 2) + g * tile_p
            out_ref[...] += jnp.where(pix < hw, per_pixel, 0.0)


def nll_loss_pallas(cls_score, label, *, loss_weight=1.0, max_tile_p=8192,
                    vmem_budget_bytes=None):
    """cls_score, label: float arrays of shape (N, C, H, W). Returns scalar loss."""
    N, C, H, W = cls_score.shape
    assert label.shape == cls_score.shape
    HW = H * W
    P = N * HW

    # Free views only: NCHW -> (N, C, H*W). No transpose, no host-side pad.
    score = cls_score.reshape(N, C, HW)
    lbl = label.reshape(N, C, HW)

    budget = (vmem_budget_bytes if vmem_budget_bytes is not None
              else _default_vmem_budget_bytes())

    # Per-lane, per-batch-entry VMEM cost: double-buffered input blocks
    # (C sublanes each) + the resident f32 accumulator block (count 2 buffers
    # to stay conservative).
    in_bytes = cls_score.dtype.itemsize + label.dtype.itemsize
    lane_cost = 2 * C * in_bytes + 2 * 4

    # Lane tile: multiple of 128, no larger than the (128-rounded) image, as
    # large as the VMEM budget allows.
    max_tile_p = max(128, (int(max_tile_p) // 128) * 128)
    hw_pad = pl.cdiv(HW, 128) * 128
    budget_lanes = max(128, (budget // lane_cost) // 128 * 128)
    tile_p = int(min(max_tile_p, hw_pad, budget_lanes))

    # Batch folding: if one tile covers the whole image and the budget allows,
    # process several batch entries per grid step (amortizes step overhead for
    # small images / large N).
    nb = 1
    if tile_p >= hw_pad and N > 1:
        tile_p = int(hw_pad)
        per_entry = tile_p * lane_cost
        max_nb = max(1, int(budget // per_entry))
        for d in range(min(N, max_nb), 0, -1):
            if N % d == 0:
                nb = d
                break

    grid_n = N // nb
    n_tiles = pl.cdiv(HW, tile_p)
    mask_needed = (HW % tile_p) != 0

    # v7x megacore: if the batch grid axis is 1, split the pixel-tile axis into
    # a parallel outer axis so both TensorCores get work. Each split writes a
    # disjoint lane segment of the output. No effect on v5e/v6e (single TC).
    n_split = 2 if (grid_n == 1 and n_tiles >= 2 and n_tiles % 2 == 0) else 1
    tiles_per_split = n_tiles // n_split

    grid = (grid_n, n_split, tiles_per_split)
    kernel = functools.partial(_nll_loss_kernel, hw=HW, tile_p=tile_p,
                               mask_needed=mask_needed)

    vmem_limit = int(min(48 << 20, max(16 << 20, budget + (8 << 20))))

    partial = pl.pallas_call(
        kernel,
        out_shape=jax.ShapeDtypeStruct((N, 1, n_split * tile_p), jnp.float32),
        grid_spec=pltpu.PrefetchScalarGridSpec(
            num_scalar_prefetch=0,
            grid=grid,
            in_specs=[
                pl.BlockSpec((nb, C, tile_p),
                             lambda n, s, i: (n, 0, s * tiles_per_split + i)),
                pl.BlockSpec((nb, C, tile_p),
                             lambda n, s, i: (n, 0, s * tiles_per_split + i)),
            ],
            out_specs=pl.BlockSpec((nb, 1, tile_p),
                                   lambda n, s, i: (n, 0, s)),
        ),
        compiler_params=pltpu.CompilerParams(
            # Batch-block and pixel-split axes are independent (megacore);
            # the innermost axis reduces into the resident output block.
            dimension_semantics=("parallel", "parallel", "arbitrary"),
            vmem_limit_bytes=vmem_limit),
    )(score, lbl)

    # Final cross-lane/batch reduction + mean + loss_weight (tiny XLA op).
    return jnp.float32(loss_weight) * jnp.sum(partial) / jnp.float32(P)


def nll_loss_reference(cls_score, label, loss_weight=1.0):
    """Pure-JAX reference mirroring the PyTorch module."""
    lbl_idx = jnp.argmax(label, axis=1)                    # (N, H, W)
    logp = jax.nn.log_softmax(cls_score, axis=1)           # (N, C, H, W)
    picked = jnp.take_along_axis(logp, lbl_idx[:, None], axis=1)[:, 0]
    return loss_weight * jnp.mean(-picked)


if __name__ == "__main__":
    key = jax.random.PRNGKey(0)
    k1, k2, k3, k4, k5, k6 = jax.random.split(key, 6)

    # Case 1: mmseg-style NCHW logits + dense label map. Whole image fits one
    # lane tile -> exercises batch folding (nb=2, single grid step).
    N, C, H, W = 2, 4, 16, 16
    cls_score = jax.random.normal(k1, (N, C, H, W), dtype=jnp.float32)
    label = jax.random.normal(k2, (N, C, H, W), dtype=jnp.float32)
    loss = jax.block_until_ready(nll_loss_pallas(cls_score, label, loss_weight=1.0))
    ref = nll_loss_reference(cls_score, label, loss_weight=1.0)
    assert jnp.allclose(loss, ref, atol=1e-5, rtol=1e-5), (loss, ref)

    # Case 2: ragged H*W with multiple pixel tiles per image (in-kernel mask on
    # the last tile only, multi-tile accumulation, batch grid axis > 1).
    N2, C2, H2, W2 = 2, 5, 12, 12            # HW = 144
    cs2 = jax.random.normal(k3, (N2, C2, H2, W2), dtype=jnp.float32)
    lb2 = jax.random.normal(k4, (N2, C2, H2, W2), dtype=jnp.float32)
    loss2 = jax.block_until_ready(
        nll_loss_pallas(cs2, lb2, loss_weight=1.0, max_tile_p=128))
    ref2 = nll_loss_reference(cs2, lb2, loss_weight=1.0)
    assert jnp.allclose(loss2, ref2, atol=1e-5, rtol=1e-5), (loss2, ref2)

    # Case 3: batch of 1 with an even number of pixel tiles -> exercises the
    # parallel pixel-split (megacore) path together with the ragged mask.
    N3, C3, H3, W3 = 1, 4, 12, 12            # HW = 144, 2 tiles of 128
    cs3 = jax.random.normal(k5, (N3, C3, H3, W3), dtype=jnp.float32)
    lb3 = jax.random.normal(k6, (N3, C3, H3, W3), dtype=jnp.float32)
    loss3 = jax.block_until_ready(
        nll_loss_pallas(cs3, lb3, loss_weight=1.0, max_tile_p=128))
    ref3 = nll_loss_reference(cs3, lb3, loss_weight=1.0)
    assert jnp.allclose(loss3, ref3, atol=1e-5, rtol=1e-5), (loss3, ref3)

    print("KERNEL_OK")
</pallas_src>

<mosaic_0001>
module attributes {stable_mosaic.version = 11 : i64} {
  func.func @_nll_loss_kernel(%arg0: i32, %arg1: i32, %arg2: i32, %arg3: memref<2x4x256xf32, #tpu.memory_space<vmem>>, %arg4: memref<2x4x256xf32, #tpu.memory_space<vmem>>, %arg5: memref<2x1x256xf32, #tpu.memory_space<vmem>>) attributes {dimension_semantics = [#tpu.dimension_semantics<parallel>, #tpu.dimension_semantics<parallel>, #tpu.dimension_semantics<arbitrary>], iteration_bounds = array<i64: 1, 1, 1>, scalar_prefetch = 0 : i64, scratch_operands = 0 : i64, tpu.core_type = #tpu.core_type<tc>, window_params = [{transform_indices = @transform_0, window_bounds = array<i64: 2, 4, 256>}, {transform_indices = @transform_1, window_bounds = array<i64: 2, 4, 256>}, {transform_indices = @transform_2, window_bounds = array<i64: 2, 1, 256>}]} {
    %c0_i32 = arith.constant 0 : i32
    %0 = arith.cmpi eq, %arg2, %c0_i32 : i32
    %1 = arith.extui %0 : i1 to i32
    %c0_i32_0 = arith.constant 0 : i32
    %2 = arith.cmpi ne, %1, %c0_i32_0 : i32
    scf.if %2 {
      %cst_16 = arith.constant 0.000000e+00 : f32
      %26 = vector.broadcast %cst_16 : f32 to vector<2x1x256xf32>
      %c0_17 = arith.constant 0 : index
      %c0_18 = arith.constant 0 : index
      %c0_19 = arith.constant 0 : index
      %27 = vector.load %arg5[%c0_17, %c0_18, %c0_19] : memref<2x1x256xf32, #tpu.memory_space<vmem>>, vector<2x1x256xf32>
      tpu.vector_store %arg5[%c0_17, %c0_18, %c0_19], %26 {strides = array<i32>} : memref<2x1x256xf32, #tpu.memory_space<vmem>>, vector<2x1x256xf32>,
    } else {
    }
    %c0 = arith.constant 0 : index
    %c0_1 = arith.constant 0 : index
    %c0_2 = arith.constant 0 : index
    %3 = vector.load %arg3[%c0, %c0_1, %c0_2] : memref<2x4x256xf32, #tpu.memory_space<vmem>>, vector<2x4x256xf32>
    %c0_3 = arith.constant 0 : index
    %c0_4 = arith.constant 0 : index
    %c0_5 = arith.constant 0 : index
    %4 = vector.load %arg4[%c0_3, %c0_4, %c0_5] : memref<2x4x256xf32, #tpu.memory_space<vmem>>, vector<2x4x256xf32>
    %cst = arith.constant dense<0xFF800000> : vector<2x256xf32>
    %5 = vector.multi_reduction <maximumf>, %3, %cst [1] : vector<2x4x256xf32> to vector<2x256xf32>
    %6 = vector.shape_cast %5 : vector<2x256xf32> to vector<2x1x256xf32>
    %7 = vector.broadcast %6 : vector<2x1x256xf32> to vector<2x4x256xf32>
    %8 = arith.subf %3, %7 : vector<2x4x256xf32>
    %9 = math.exp %8 : vector<2x4x256xf32>
    %cst_6 = arith.constant dense<0.000000e+00> : vector<2x256xf32>
    %10 = vector.multi_reduction <add>, %9, %cst_6 [1] : vector<2x4x256xf32> to vector<2x256xf32>
    %11 = vector.shape_cast %10 : vector<2x256xf32> to vector<2x1x256xf32>
    %12 = math.log %11 : vector<2x1x256xf32>
    %13 = arith.addf %6, %12 : vector<2x1x256xf32>
    %cst_7 = arith.constant dense<0xFF800000> : vector<2x256xf32>
    %14 = vector.multi_reduction <maximumf>, %4, %cst_7 [1] : vector<2x4x256xf32> to vector<2x256xf32>
    %15 = vector.shape_cast %14 : vector<2x256xf32> to vector<2x1x256xf32>
    %16 = vector.broadcast %15 : vector<2x1x256xf32> to vector<2x4x256xf32>
    %17 = arith.cmpf oeq, %4, %16 : vector<2x4x256xf32>
    %cst_8 = arith.constant 0xFF800000 : f32
    %18 = vector.broadcast %cst_8 : f32 to vector<2x4x256xf32>
    %19 = arith.select %17, %3, %18 : vector<2x4x256xi1>, vector<2x4x256xf32>
    %cst_9 = arith.constant dense<0xFF800000> : vector<2x256xf32>
    %20 = vector.multi_reduction <maximumf>, %19, %cst_9 [1] : vector<2x4x256xf32> to vector<2x256xf32>
    %21 = vector.shape_cast %20 : vector<2x256xf32> to vector<2x1x256xf32>
    %22 = arith.subf %13, %21 : vector<2x1x256xf32>
    %c0_10 = arith.constant 0 : index
    %c0_11 = arith.constant 0 : index
    %c0_12 = arith.constant 0 : index
    %23 = vector.load %arg5[%c0_10, %c0_11, %c0_12] : memref<2x1x256xf32, #tpu.memory_space<vmem>>, vector<2x1x256xf32>
    %24 = arith.addf %23, %22 : vector<2x1x256xf32>
    %c0_13 = arith.constant 0 : index
    %c0_14 = arith.constant 0 : index
    %c0_15 = arith.constant 0 : index
    %25 = vector.load %arg5[%c0_13, %c0_14, %c0_15] : memref<2x1x256xf32, #tpu.memory_space<vmem>>, vector<2x1x256xf32>
    tpu.vector_store %arg5[%c0_13, %c0_14, %c0_15], %24 {strides = array<i32>} : memref<2x1x256xf32, #tpu.memory_space<vmem>>, vector<2x1x256xf32>,
    return
  }
  func.func @transform_0(%arg0: i32, %arg1: i32, %arg2: i32) -> (i32, i32, i32) {
    %c1_i32 = arith.constant 1 : i32
    %0 = arith.muli %arg1, %c1_i32 : i32
    %1 = arith.addi %0, %arg2 : i32
    %c0_i32 = arith.constant 0 : i32
    %c0_i32_0 = arith.constant 0 : i32
    return %arg0, %c0_i32, %1 : i32, i32, i32
  }
  func.func @transform_1(%arg0: i32, %arg1: i32, %arg2: i32) -> (i32, i32, i32) {
    %c1_i32 = arith.constant 1 : i32
    %0 = arith.muli %arg1, %c1_i32 : i32
    %1 = arith.addi %0, %arg2 : i32
    %c0_i32 = arith.constant 0 : i32
    %c0_i32_0 = arith.constant 0 : i32
    return %arg0, %c0_i32, %1 : i32, i32, i32
  }
  func.func @transform_2(%arg0: i32, %arg1: i32, %arg2: i32) -> (i32, i32, i32) {
    %c0_i32 = arith.constant 0 : i32
    %c0_i32_0 = arith.constant 0 : i32
    return %arg0, %c0_i32, %arg1 : i32, i32, i32
  }
}

</mosaic_0001>

<bundles_post_ra>
// kernel: tpu_custom_call.1
= control target key start
LH: loop header
LB: loop body
LE: loop exit
PB: predicated region body
PF: predicated region fallthrough
CT: control target
= control target key end

     0   :  { %7 = vsyncpa [#allocation3], 0  ;;  %s538_s0 = inlined_call_operand.hbm [shape: f32[2,4,256], index: 0, kind: input, shape index: {}]   ;;  %s539_s1 = inlined_call_operand.hbm [shape: f32[2,4,256], index: 1, kind: input, shape index: {}]   ;;  %s540_s2 = inlined_call_operand.hbm [shape: f32[2,1,256], index: 2, kind: output, shape index: {}]  }
   0x1   :  { %8 = vsyncpa [#allocation6], 0 }
   0x2   :  { %9 = vsyncpa [#allocation4], 0  ;;  %s406_s9 = smov [#allocation2]   ;;  %s334_s13 = scalar_lea.hbm %s538_s0, 256 }
   0x3   :  { %s19_s10 = sshll.u32 %s406_s9, 4  ;;  %p335_p0 = scmp.ne.s32.totalorder %s538_s0, %s334_s13  ;;  %s20_s10 = int_to_ptr.vmem [resolvable:$true] %s19_s10 }
   0x4   :  { %p338_p1 = scmp.lt.u32.totalorder %s334_s13, %s538_s0 }
   0x6   :  { %p340_p2 = pnand %p338_p1, %p335_p0 }
   0x8   :  { %343 = shalt.err (!%p340_p2)
}
   0x9   :  { %s344_s18 = scalar_lea.vmem %s20_s10, 256  ;;  %p349_p4 = scmp.lt.s32.totalorder %s20_s10, %s20_s10 }
   0xa   :  { %p345_p3 = scmp.ne.s32.totalorder %s20_s10, %s344_s18  ;;  %p350_p5 = scmp.lt.s32.totalorder %s344_s18, %s344_s18 }
   0xc   :  { %p351_p6 = por %p350_p5, %p349_p4 }
   0xe   :  { %p352_p7 = pnand %p351_p6, %p345_p3 }
  0x10   :  { %355 = shalt.err (!%p352_p7)
}
  0x11   :  { %s407_s19 = smov 128   ;;  %s408_s20 = smov 8  }
  0x12   :  { %25 = dma.hbm_to_vmem [thread:$0]  %s538_s0, 256, %s20_s10, [#allocation3], %s407_s19, %s407_s19, %s408_s20  }
  0x13   :  { %s409_s23 = smov [#allocation5]   ;;  %s356_s27 = scalar_lea.hbm %s539_s1, 256 }
  0x14   :  { %s35_s24 = sshll.u32 %s409_s23, 4  ;;  %p357_p8 = scmp.ne.s32.totalorder %s539_s1, %s356_s27  ;;  %s36_s24 = int_to_ptr.vmem [resolvable:$true] %s35_s24 }
  0x15   :  { %p360_p9 = scmp.lt.u32.totalorder %s356_s27, %s539_s1 }
  0x17   :  { %p362_p10 = pnand %p360_p9, %p357_p8 }
  0x19   :  { %365 = shalt.err (!%p362_p10)
}
  0x1a   :  { %s366_s4 = scalar_lea.vmem %s36_s24, 256  ;;  %p371_p12 = scmp.lt.s32.totalorder %s36_s24, %s36_s24 }
  0x1b   :  { %p367_p11 = scmp.ne.s32.totalorder %s36_s24, %s366_s4  ;;  %p372_p13 = scmp.lt.s32.totalorder %s366_s4, %s366_s4 }
  0x1d   :  { %p373_p0 = por %p372_p13, %p371_p12 }
  0x1f   :  { %p374_p1 = pnand %p373_p0, %p367_p11 }
  0x21   :  { %377 = shalt.err (!%p374_p1)
}
  0x22   :  { %41 = dma.hbm_to_vmem [thread:$0]  %s539_s1, 256, %s36_s24, [#allocation6], %s407_s19, %s407_s19, %s408_s20  }
  0x23   :  { %400 = dma.done.wait [#allocation3], 256  }
  0x24   :  { %401 = vsyncadd [#allocation3], 4294967040 }
  0x25   :  { %402 = dma.done.wait [#allocation6], 256  }
  0x26   :  { %403 = vsyncadd [#allocation6], 4294967040  ;;  %v56_v0 = vlaneseq  ;;  %v410_v2 = vmov 0.0   ;;  %vm72_vm1 = vcmask 1043456   ;;  %v463_v3 = vld [vmem:[#allocation2] sm:$0xff]  ;;  %v465_v4 = vld [vmem:[#allocation5] sm:$0xff] }
  0x27   :  { %v467_v5 = vld [vmem:[#allocation2 + $0x8] sm:$0xff]  ;;  %v68_v6 = vcombine.high %v463_v3, %v463_v3  ;;  %v73_v7 = vsel %vm72_vm1, %v463_v3, -inf  ;;  %v163_v8 = vcombine.high %v465_v4, %v465_v4  ;;  %v167_v9 = vsel %vm72_vm1, %v465_v4, -inf  ;;  %v477_v10 = vld [vmem:[#allocation5 + $0x8] sm:$0xff]  ;;  %s412_s1 = smov [#allocation7]  }
  0x28   :  { %vm455_vm0 = vcmp.lt.s32.totalorder %v56_v0, 256  ;;  %v74_v11 = vrot.slane %v73_v7, 4  ;;  %v168_v12 = vrot.slane %v167_v9, 4  ;;  %v69_v13 = vcombine.high %v467_v5, %v467_v5  ;;  %s296_s6 = sshll.u32 %s412_s1, 4  ;;  %s297_s6 = int_to_ptr.vmem [resolvable:$true] %s296_s6 }
  0x29   :  { %60 = vst.msk [vmem:[#allocation7] sm:$0x3] %vm455_vm0, %v410_v2  ;;  %61 = vst.msk [vmem:[#allocation7 + $0x2] sm:$0x3] %vm455_vm0, %v410_v2  ;;  %v87_v14 = vsel %vm72_vm1, %v467_v5, -inf  ;;  %v80_v15 = vsel %vm72_vm1, %v68_v6, -inf  ;;  %v164_v18 = vcombine.high %v477_v10, %v477_v10  ;;  %p383_p3 = scmp.lt.s32.totalorder %s297_s6, %s297_s6 }
  0x2a   :  { %v174_v16 = vsel %vm72_vm1, %v163_v8, -inf  ;;  %v88_v17 = vrot.slane %v87_v14, 4  ;;  %v75_v19 = vmax.f32 %v73_v7, %v74_v11  ;;  %v81_v20 = vrot.slane %v80_v15, 4  ;;  %s378_s7 = scalar_lea.vmem %s297_s6, 64 }
  0x2b   :  { %v169_v21 = vmax.f32 %v167_v9, %v168_v12  ;;  %v175_v22 = vrot.slane %v174_v16, 4  ;;  %v94_v24 = vsel %vm72_vm1, %v69_v13, -inf  ;;  %v181_v25 = vsel %vm72_vm1, %v477_v10, -inf  ;;  %p379_p2 = scmp.ne.s32.totalorder %s297_s6, %s378_s7  ;;  %p384_p4 = scmp.lt.s32.totalorder %s378_s7, %s378_s7 }
  0x2c   :  { %v89_v23 = vmax.f32 %v87_v14, %v88_v17  ;;  %v188_v26 = vsel %vm72_vm1, %v164_v18, -inf  ;;  %v76_v27 = vrot.slane %v75_v19, 2  ;;  %v82_v28 = vmax.f32 %v80_v15, %v81_v20 }
  0x2d   :  { %v170_v29 = vrot.slane %v169_v21, 2  ;;  %v176_v30 = vmax.f32 %v174_v16, %v175_v22  ;;  %v95_v32 = vrot.slane %v94_v24, 4  ;;  %v182_v33 = vrot.slane %v181_v25, 4  ;;  %p385_p5 = por %p384_p4, %p383_p3 }
  0x2e   :  { %v90_v31 = vrot.slane %v89_v23, 2  ;;  %v189_v34 = vrot.slane %v188_v26, 4  ;;  %v77_v35 = vmax.f32 %v75_v19, %v76_v27  ;;  %v83_v36 = vrot.slane %v82_v28, 2 }
  0x2f   :  { %v171_v37 = vmax.f32 %v169_v21, %v170_v29  ;;  %v177_v38 = vrot.slane %v176_v30, 2  ;;  %v96_v40 = vmax.f32 %v94_v24, %v95_v32  ;;  %v183_v41 = vmax.f32 %v181_v25, %v182_v33  ;;  %p386_p6 = pnand %p385_p5, %p379_p2 }
  0x30   :  { %v91_v39 = vmax.f32 %v89_v23, %v90_v31  ;;  %v190_v42 = vmax.f32 %v188_v26, %v189_v34  ;;  %v78_v43 = vrot.slane %v77_v35, 1  ;;  %v84_v44 = vmax.f32 %v82_v28, %v83_v36 }
  0x31   :  { %v178_v45 = vmax.f32 %v176_v30, %v177_v38  ;;  %v97_v47 = vrot.slane %v96_v40, 2  ;;  %v184_v48 = vrot.slane %v183_v41, 2  ;;  %v172_v52 = vrot.slane %v171_v37, 1 }
  0x32   :  { %v92_v46 = vrot.slane %v91_v39, 1  ;;  %v191_v49 = vrot.slane %v190_v42, 2  ;;  %v491_v50 = vmax.f32 %v77_v35, %v78_v43  ;;  %v85_v51 = vrot.slane %v84_v44, 1 }
  0x33   :  { %v179_v53 = vrot.slane %v178_v45, 1  ;;  %v98_v54 = vmax.f32 %v96_v40, %v97_v47  ;;  %v185_v55 = vmax.f32 %v183_v41, %v184_v48  ;;  %v173_v61 = vmax.f32 %v171_v37, %v172_v52 }
  0x34   :  { %v192_v56 = vmax.f32 %v190_v42, %v191_v49  ;;  %v493_v57 = vmax.f32 %v84_v44, %v85_v51  ;;  %v495_v58 = vmax.f32 %v91_v39, %v92_v46 }
  0x35   :  { %v99_v59 = vrot.slane %v98_v54, 1  ;;  %v180_v62 = vmax.f32 %v178_v45, %v179_v53  ;;  %v186_v2 = vrot.slane %v185_v55, 1 }
  0x36   :  { %v105_v60 = vcombine.low %v491_v50, %v493_v57  ;;  %v193_v6 = vrot.slane %v192_v56, 1 }
  0x37   :  { %v499_v63 = vmax.f32 %v98_v54, %v99_v59  ;;  %v199_v11 = vcombine.low %v173_v61, %v180_v62  ;;  %v187_v13 = vmax.f32 %v185_v55, %v186_v2 }
  0x38   :  { %v109_v7 = vsub.f32 %v463_v3, %v105_v60  ;;  %v194_v14 = vmax.f32 %v192_v56, %v193_v6 }
  0x39   :  { %v106_v8 = vcombine.low %v495_v58, %v499_v63  ;;  %vm203_vm2 = vcmp.eq.f32.partialorder %v465_v4, %v199_v11 }
  0x3a   :  { %v111_v9 = vmul.f32 1.442695, %v109_v7  ;;  %v200_v16 = vcombine.low %v187_v13, %v194_v14  ;;  %v205_v17 = vsel %vm203_vm2, %v463_v3, -inf }
  0x3b   :  { %v110_v12 = vsub.f32 %v467_v5, %v106_v8  ;;  %v209_v18 = vcombine.high %v205_v17, %v205_v17  ;;  %v213_v24 = vsel %vm72_vm1, %v205_v17, -inf }
  0x3c   :  { %322 = vpow2.f32 %v111_v9  ;;  %vm204_vm3 = vcmp.eq.f32.partialorder %v477_v10, %v200_v16  ;;  %v214_v30 = vrot.slane %v213_v24, 4  ;;  %v411_v16 = vmov 1966171168  }
  0x3d   :  { %v113_v15 = vmul.f32 1.442695, %v110_v12  ;;  %v206_v20 = vsel %vm204_vm3, %v467_v5, -inf  ;;  %v220_v4 = vsel %vm72_vm1, %v209_v18, -inf  ;;  %v253_v17 = vunpack.c.l.s4 %v411_v16 }
  0x3e   :  { %v210_v27 = vcombine.high %v206_v20, %v206_v20  ;;  %v227_v5 = vsel %vm72_vm1, %v206_v20, -inf  ;;  %v221_v35 = vrot.slane %v220_v4, 4  ;;  %v215_v42 = vmax.f32 %v213_v24, %v214_v30 }
  0x3f   :  { %324 = vpow2.f32 %v113_v15  ;;  %v228_v41 = vrot.slane %v227_v5, 4  ;;  %v256_v24 = vshrl.u32 %v56_v0, 7 }
  0x40   :  { %v234_v38 = vsel %vm72_vm1, %v210_v27, -inf  ;;  %v222_v48 = vmax.f32 %v220_v4, %v221_v35  ;;  %v216_v55 = vrot.slane %v215_v42, 2  ;;  %v254_v4 = vunpack.c.0.s8 %v253_v17 }
  0x41   :  { %v235_v47 = vrot.slane %v234_v38, 4  ;;  %v229_v54 = vmax.f32 %v227_v5, %v228_v41 }
  0x42   :  { %v223_v62 = vrot.slane %v222_v48, 2  ;;  %v217_v8 = vmax.f32 %v215_v42, %v216_v55  ;;  %v257_v35 = vsub.s32 %v254_v4, %v256_v24 }
  0x43   :  { %v236_v61 = vmax.f32 %v234_v38, %v235_v47  ;;  %v230_v7 = vrot.slane %v229_v54, 2 }
  0x44   :  { %v224_v12 = vmax.f32 %v222_v48, %v223_v62  ;;  %v218_v14 = vrot.slane %v217_v8, 1 }
  0x45   :  { %v237_v11 = vrot.slane %v236_v61, 2  ;;  %v231_v13 = vmax.f32 %v229_v54, %v230_v7 }
  0x46   :  { %v323_v19 = vpop.eup %322  ;;  %v225_v18 = vrot.slane %v224_v12, 1 }
  0x47   :  { %v117_v21 = vcombine.high %v323_v19, %v323_v19  ;;  %v121_v22 = vsel %vm72_vm1, %v323_v19, 0.0  ;;  %v238_v15 = vmax.f32 %v236_v61, %v237_v11  ;;  %v232_v20 = vrot.slane %v231_v13, 1 }
  0x48   :  { %v122_v23 = vrot.slane %v121_v22, 4 }
  0x49   :  { %v325_v25 = vpop.eup %324  ;;  %v128_v26 = vsel %vm72_vm1, %v117_v21, 0.0 }
  0x4a   :  { %v123_v28 = vadd.f32 %v122_v23, %v121_v22  ;;  %v129_v3 = vrot.slane %v128_v26, 4  ;;  %v118_v29 = vcombine.high %v325_v25, %v325_v25  ;;  %v135_v10 = vsel %vm72_vm1, %v325_v25, 0.0 }
  0x4b   :  { %v136_v31 = vrot.slane %v135_v10, 4  ;;  %v219_v22 = vmax.f32 %v217_v8, %v218_v14  ;;  %v239_v25 = vrot.slane %v238_v15, 1 }
  0x4c   :  { %v124_v32 = vrot.slane %v123_v28, 2  ;;  %v130_v33 = vadd.f32 %v129_v3, %v128_v26  ;;  %v142_v34 = vsel %vm72_vm1, %v118_v29, 0.0  ;;  %v226_v3 = vmax.f32 %v224_v12, %v225_v18 }
  0x4d   :  { %v137_v36 = vadd.f32 %v136_v31, %v135_v10  ;;  %v143_v37 = vrot.slane %v142_v34, 4  ;;  %v233_v10 = vmax.f32 %v231_v13, %v232_v20 }
  0x4e   :  { %v125_v39 = vadd.f32 %v124_v32, %v123_v28  ;;  %v131_v40 = vrot.slane %v130_v33, 2 }
  0x4f   :  { %v138_v43 = vrot.slane %v137_v36, 2  ;;  %v144_v44 = vadd.f32 %v143_v37, %v142_v34  ;;  %v240_v34 = vmax.f32 %v238_v15, %v239_v25 }
  0x50   :  { %v126_v45 = vrot.slane %v125_v39, 1  ;;  %v132_v46 = vadd.f32 %v131_v40, %v130_v33 }
  0x51   :  { %v139_v49 = vadd.f32 %v138_v43, %v137_v36  ;;  %v145_v51 = vrot.slane %v144_v44, 2 }
  0x52   :  { %v127_v52 = vadd.f32 %v126_v45, %v125_v39  ;;  %v133_v53 = vrot.slane %v132_v46, 1  ;;  %v246_v45 = vld [vmem:[#allocation7 + $0x2] sm:$0x3] }
  0x53   :  { %v140_v56 = vrot.slane %v139_v49, 1  ;;  %v146_v59 = vadd.f32 %v145_v51, %v144_v44 }
  0x54   :  { %v134_v60 = vadd.f32 %v133_v53, %v132_v46  ;;  %326 = vlog2.f32 %v127_v52 }
  0x55   :  { %v141_v2 = vadd.f32 %v140_v56, %v139_v49  ;;  %v147_v6 = vrot.slane %v146_v59, 1 }
  0x56   :  { %328 = vlog2.f32 %v134_v60 }
  0x57   :  { %v148_v9 = vadd.f32 %v147_v6, %v146_v59  ;;  %330 = vlog2.f32 %v141_v2 }
  0x59   :  { %332 = vlog2.f32 %v148_v9 }
  0x5e   :  { %v327_v19 = vpop.eup %326 }
  0x5f   :  { %v150_v21 = vmul.f32 0.6931472, %v327_v19 }
  0x60   :  { %v329_v23 = vpop.eup %328 }
  0x61   :  { %v331_v26 = vpop.eup %330  ;;  %v152_v27 = vmul.f32 0.6931472, %v329_v23  ;;  %v157_v28 = vadd.f32 %v150_v21, %v491_v50  ;;  %v245_v50 = vld [vmem:[#allocation7] sm:$0x3] }
  0x62   :  { %v154_v29 = vmul.f32 0.6931472, %v331_v26 }
  0x63   :  { %v333_v30 = vpop.eup %332  ;;  %v158_v31 = vadd.f32 %v152_v27, %v493_v57  ;;  %v241_v5 = vsub.f32 %v157_v28, %v219_v22 }
  0x64   :  { %v156_v32 = vmul.f32 0.6931472, %v333_v30  ;;  %v159_v33 = vadd.f32 %v154_v29, %v495_v58 }
  0x65   :  { %v242_v36 = vsub.f32 %v158_v31, %v226_v3 }
  0x66   :  { %v160_v0 = vadd.f32 %v156_v32, %v499_v63  ;;  %v243_v37 = vsub.f32 %v159_v33, %v233_v10 }
  0x67   :  { %v251_v38 = vcombine.low %v241_v5, %v242_v36 }
  0x68   :  { %v244_v39 = vsub.f32 %v160_v0, %v240_v34 }
  0x69   :  { %v258_v40 = vrot.slane %v251_v38, %v257_v35 }
  0x6a   :  { %v266_v41 = vcombine.low %v243_v37, %v244_v39 }
  0x6b   :  { %v265_v42 = vrot.slane %v258_v40, %v257_v35 }
  0x6c   :  { %v273_v43 = vrot.slane %v266_v41, %v257_v35 }
  0x6d   :  { %v283_v44 = vadd.f32 %v265_v42, %v245_v50 }
  0x6e   :  { %v280_v57 = vrot.slane %v273_v43, %v257_v35 }
  0x6f   :  { %289 = vst.msk [vmem:[#allocation7] sm:$0x3] %vm455_vm0, %v283_v44 }
  0x70   :  { %v284_v58 = vadd.f32 %v280_v57, %v246_v45 }
  0x72   :  { %290 = vst.msk [vmem:[#allocation7 + $0x2] sm:$0x3] %vm455_vm0, %v284_v58 }
  0x73   :  { %389 = shalt.err (!%p386_p6)
}
  0x74   :  { %s390_s10 = scalar_lea.hbm %s540_s2, 64 }
  0x75   :  { %p391_p7 = scmp.ne.s32.totalorder %s540_s2, %s390_s10  ;;  %p394_p8 = scmp.lt.u32.totalorder %s390_s10, %s540_s2 }
  0x77   :  { %p396_p9 = pnand %p394_p8, %p391_p7 }
  0x79   :  { %399 = shalt.err (!%p396_p9)
}
  0x7a   :  { %s413_s15 = smov 32   ;;  %s414_s16 = smov 2  }
  0x7b   :  { %302 = dma.vmem_to_hbm [thread:$0]  %s297_s6, 64, %s540_s2, [#allocation4], %s413_s15, %s413_s15, %s414_s16  }
  0x7c   :  { %404 = dma.done.wait [#allocation4], 64  }
  0x7d   :  { %405 = vsyncadd [#allocation4], 4294967232 }
  0x7e   :  { %306 = vsyncpa [#allocation3], 1 }
  0x7f   :  { %307 = vsyncpa [#allocation6], 1 }
  0x80   :  { %308 = vsyncpa [#allocation4], 1 }

</bundles_post_ra>
